<compile_context>
chip_gen: v7x
topology: tpu7x:2x2x1
jax: 0.10.0
libtpu: 0.0.40
codegen_flags: <defaults>
</compile_context>

<pallas_src>
import functools

import numpy as np
import jax
import jax.numpy as jnp
from jax import lax
from jax.experimental import pallas as pl
from jax.experimental.pallas import tpu as pltpu

_LOG_2PI = float(np.log(2.0 * np.pi))
_EPS = 1e-9
_NEG_BIG = -1e30


def _round_up(a, b):
    return (a + b - 1) // b * b


def _gmm_loss_kernel(x_ref, spots_ref, out_ref, *,
                     num_params, num_spots, hw, hwp, width, tb, bf):
    """One grid step = TB frames, vectorized over the frame axis.

    x_ref     : [TB, C, HWp]   C = 1 + 2K (prob | K means | K sigmas)
    spots_ref : [TB, S, 1+K]   [..., 0] = active flag, [..., 1:] = GT params
    out_ref   : [1, 1, 128]    per-block sum of per-frame losses (splat)
    """
    K = num_params
    S = num_spots

    # pixel index along lanes: grid offsets + padded-lane mask
    pix_i = lax.broadcasted_iota(jnp.int32, (1, hwp), 1)        # [1, HWp]
    pix_f = pix_i.astype(jnp.float32)
    gy = jnp.floor(pix_f / float(width))                        # row index
    gx = pix_f - gy * float(width)                              # col index
    lane_valid = pix_i < hw                                     # [1, HWp]

    prob = x_ref[:, 0:1, :][:, 0, :]                            # [TB, HWp]
    sigma = x_ref[:, 1 + K:1 + 2 * K, :]                        # [TB, K, HWp]
    if hwp != hw:
        # keep log()/reciprocal finite on padded pixels (masked out below)
        sigma = jnp.where(lane_valid[None], sigma, 1.0)
    inv_sigma = 1.0 / sigma                                     # hoisted: K*HWp (not K*S*HWp)
    sum_log_sigma = jnp.sum(jnp.log(sigma), axis=1)             # [TB, HWp], hoisted

    spots = spots_ref[...]                                      # [TB, S, 1+K]
    active = spots[:, :, 0]                                     # [TB, S]

    # ---- count loss (Gaussian approximation of the Poisson-binomial) ----
    p_sum = jnp.sum(prob, axis=-1, keepdims=True)               # [TB, 1]
    p_var = jnp.sum(prob * (1.0 - prob), axis=-1, keepdims=True) + _EPS
    count = jnp.sum(active, axis=-1, keepdims=True)             # [TB, 1]
    count_loss = ((count - p_sum) ** 2) / (2.0 * p_var) \
        + 0.5 * jnp.log(2.0 * jnp.pi * p_var)                   # [TB, 1]

    # ---- localization loss: mixture of per-pixel Gaussians ----
    sq = jnp.zeros((tb, S, hwp), jnp.float32)
    for k in range(K):                                          # K is small & static
        mu_k = x_ref[:, 1 + k:2 + k, :][:, 0, :]                # [TB, HWp]
        # DECODE convention: x/y mean channels are sub-pixel offsets -> add grid.
        # (assumes param_names[0:2] == (x, y))
        if k == 0:
            mu_k = mu_k + gx
        elif k == 1:
            mu_k = mu_k + gy
        t_k = spots[:, :, k + 1:k + 2]                          # [TB, S, 1]
        z = (t_k - mu_k[:, None, :]) * inv_sigma[:, k, :][:, None, :]
        sq = sq + z * z                                         # [TB, S, HWp]
    log_n = -0.5 * sq - sum_log_sigma[:, None, :] - 0.5 * K * _LOG_2PI

    # mixture weights p_k / sum(p)
    log_w = jnp.log(prob + _EPS) - jnp.log(p_sum + _EPS)        # [TB, HWp]
    logits = log_n + log_w[:, None, :]                          # [TB, S, HWp]
    if hwp != hw:
        logits = jnp.where(lane_valid[None], logits, _NEG_BIG)  # mask padded pixels

    # logsumexp over pixels (lane-axis reduction)
    m = jnp.max(logits, axis=-1, keepdims=True)                 # [TB, S, 1]
    lse = m + jnp.log(jnp.sum(jnp.exp(logits - m), axis=-1, keepdims=True))
    loc_loss = -jnp.sum(active * lse[:, :, 0], axis=-1, keepdims=True)   # [TB, 1]

    total = count_loss + loc_loss                               # [TB, 1]

    if bf % tb != 0:
        # mask frames beyond the true batch (grid padding); padded frames may
        # contain inf/nan — the select discards them safely.
        fidx = pl.program_id(0) * tb + lax.broadcasted_iota(jnp.int32, (tb, 1), 0)
        total = jnp.where(fidx < bf, total, 0.0)

    block_sum = jnp.sum(total)
    out_ref[...] = jnp.broadcast_to(block_sum, out_ref.shape).astype(out_ref.dtype)


def _pick_frames_per_block(bf, c, hwp, s, k):
    """Frames per grid step, sized for VMEM (conservative across v5e/v6e/v7x)."""
    try:
        cap = pltpu.get_tpu_info().vmem_capacity_bytes
    except Exception:
        cap = 64 * 1024 * 1024                                  # v7x-safe fallback
    budget = max(4 * 1024 * 1024, min(cap // 4, 16 * 1024 * 1024))
    # VMEM-padded per-frame input block + ~6 live [S, HWp] f32 temporaries
    in_frame = (_round_up(c, 8) * hwp + _round_up(s, 8) * _round_up(1 + k, 128)) * 4
    inter_frame = 6 * _round_up(s, 8) * hwp * 4
    per_frame = 2 * in_frame + inter_frame                      # 2x: double buffering
    return int(max(1, min(bf, 128, budget // max(1, per_frame))))


def single_frame_gmm_loss(model_output, targets, *, param_names,
                          return_loss_dict=False):
    """JAX/Pallas equivalent of SingleFrameGMMLoss.forward."""
    spots = targets['spots']
    B, F, C, H, W = model_output.shape
    K = len(param_names)
    assert C == 1 + 2 * K, "expected channels = 1 + 2*num_params"
    BF, HW = B * F, H * W
    S = spots.shape[-2]
    HWp = _round_up(HW, 128)                                    # lane-aligned pixels

    # Single slab; NO wrapper-side channel slicing or grid-offset adds
    # (fused in the kernel).  reshape/astype are no-ops for contiguous f32.
    x = model_output.reshape(BF, C, HW).astype(jnp.float32)
    if HWp != HW:
        x = jnp.pad(x, ((0, 0), (0, 0), (0, HWp - HW)))
    sp = spots.reshape(BF, S, 1 + K).astype(jnp.float32)

    TB = _pick_frames_per_block(BF, C, HWp, S, K)
    NB = (BF + TB - 1) // TB
    BFp = NB * TB
    if BFp != BF:                                               # pad frames; masked in-kernel
        x = jnp.pad(x, ((0, BFp - BF), (0, 0), (0, 0)))
        sp = jnp.pad(sp, ((0, BFp - BF), (0, 0), (0, 0)))

    kernel = functools.partial(
        _gmm_loss_kernel, num_params=K, num_spots=S,
        hw=HW, hwp=HWp, width=W, tb=TB, bf=BF)

    per_block = pl.pallas_call(
        kernel,
        out_shape=jax.ShapeDtypeStruct((NB, 1, 128), jnp.float32),
        grid_spec=pltpu.PrefetchScalarGridSpec(
            num_scalar_prefetch=0,
            grid=(NB,),
            in_specs=[
                pl.BlockSpec((TB, C, HWp), lambda i: (i, 0, 0)),
                pl.BlockSpec((TB, S, 1 + K), lambda i: (i, 0, 0)),
            ],
            out_specs=pl.BlockSpec((1, 1, 128), lambda i: (i, 0, 0)),
        ),
        compiler_params=pltpu.CompilerParams(
            dimension_semantics=("parallel",),     # keep both v7x TCs busy
            vmem_limit_bytes=32 * 1024 * 1024),
    )(x, sp)

    loss = jnp.sum(per_block[:, 0, 0]) / BF                     # .mean() over frames

    if return_loss_dict:
        return loss, dict(targets=targets['spots'], outputs=model_output)
    return loss


def _reference_loss(model_output, spots, K):
    """Pure-JAX reference of the same math (for verification)."""
    B, F, C, H, W = model_output.shape
    BF, HW, S = B * F, H * W, spots.shape[-2]
    x = model_output.reshape(BF, C, HW).astype(jnp.float32)
    prob, mu, sigma = x[:, 0], x[:, 1:1 + K], x[:, 1 + K:1 + 2 * K]
    gx = jnp.tile(jnp.arange(W, dtype=jnp.float32), (H,))
    gy = jnp.repeat(jnp.arange(H, dtype=jnp.float32), W)
    mu = mu.at[:, 0].add(gx).at[:, 1].add(gy)
    sp = spots.reshape(BF, S, 1 + K).astype(jnp.float32)
    active, t = sp[:, :, 0], sp[:, :, 1:]
    p_sum = prob.sum(-1)
    p_var = (prob * (1 - prob)).sum(-1) + _EPS
    count = active.sum(-1)
    count_loss = (count - p_sum) ** 2 / (2 * p_var) \
        + 0.5 * jnp.log(2 * jnp.pi * p_var)
    z = (t[:, :, :, None] - mu[:, None]) / sigma[:, None]
    log_n = (-0.5 * z * z - jnp.log(sigma[:, None])).sum(2) - 0.5 * K * _LOG_2PI
    log_w = jnp.log(prob + _EPS) - jnp.log(p_sum + _EPS)[:, None]
    lse = jax.scipy.special.logsumexp(log_n + log_w[:, None, :], axis=-1)
    loc_loss = -(active * lse).sum(-1)
    return jnp.mean(count_loss + loc_loss)


if __name__ == "__main__":
    param_names = ['x', 'y', 'I', 'z']           # K = 4
    K = len(param_names)
    B, F, H, W, S = 2, 1, 16, 16, 8
    C = 1 + 2 * K

    key = jax.random.PRNGKey(0)
    k1, k2, k3 = jax.random.split(key, 3)

    raw = jax.random.normal(k1, (B, F, C, H, W), jnp.float32)
    prob_ch = jax.nn.sigmoid(raw[:, :, 0:1]) * 0.1          # detection probs
    mu_ch = raw[:, :, 1:1 + K] * 0.5                        # sub-pixel offsets etc.
    sigma_ch = jax.nn.softplus(raw[:, :, 1 + K:]) + 0.05    # positive sigmas
    model_output = jnp.concatenate([prob_ch, mu_ch, sigma_ch], axis=2)

    active = (jnp.arange(S) < 5).astype(jnp.float32)
    active = jnp.broadcast_to(active[None, None, :, None], (B, F, S, 1))
    xy = jax.random.uniform(k2, (B, F, S, 2), minval=0.0, maxval=float(W))
    other = jax.random.normal(k3, (B, F, S, K - 2)) * 2.0 + 5.0
    spots = jnp.concatenate([active, xy, other], axis=-1)   # [B, F, S, 1+K]
    targets = {'spots': spots}

    loss_fn = jax.jit(functools.partial(single_frame_gmm_loss,
                                        param_names=param_names))
    loss = loss_fn(model_output, targets)
    jax.block_until_ready(loss)

    ref = _reference_loss(model_output, spots, K)
    np.testing.assert_allclose(np.asarray(loss), np.asarray(ref),
                               rtol=1e-4, atol=1e-4)
    print("KERNEL_OK")
</pallas_src>

<mosaic_0001>
module attributes {stable_mosaic.version = 11 : i64} {
  func.func @_gmm_loss_kernel(%arg0: i32, %arg1: memref<2x9x256xf32, #tpu.memory_space<vmem>>, %arg2: memref<2x8x5xf32, #tpu.memory_space<vmem>>, %arg3: memref<1x1x128xf32, #tpu.memory_space<vmem>>) attributes {dimension_semantics = [#tpu.dimension_semantics<parallel>], iteration_bounds = array<i64: 1>, scalar_prefetch = 0 : i64, scratch_operands = 0 : i64, tpu.core_type = #tpu.core_type<tc>, window_params = [{transform_indices = @transform_0, window_bounds = array<i64: 2, 9, 256>}, {transform_indices = @transform_1, window_bounds = array<i64: 2, 8, 5>}, {transform_indices = @transform_2, window_bounds = array<i64: 1, 1, 128>}]} {
    %0 = tpu.iota {dimensions = array<i32: 1>} : vector<1x256xi32>
    %1 = arith.sitofp %0 : vector<1x256xi32> to vector<1x256xf32>
    %cst = arith.constant 1.600000e+01 : f32
    %2 = vector.broadcast %cst : f32 to vector<1x256xf32>
    %3 = arith.divf %1, %2 : vector<1x256xf32>
    %4 = math.floor %3 : vector<1x256xf32>
    %cst_0 = arith.constant 1.600000e+01 : f32
    %5 = vector.broadcast %cst_0 : f32 to vector<1x256xf32>
    %6 = arith.mulf %4, %5 : vector<1x256xf32>
    %7 = arith.subf %1, %6 : vector<1x256xf32>
    %c0 = arith.constant 0 : index
    %c0_1 = arith.constant 0 : index
    %c0_2 = arith.constant 0 : index
    %8 = vector.load %arg1[%c0, %c0_1, %c0_2] : memref<2x9x256xf32, #tpu.memory_space<vmem>>, vector<2x1x256xf32>
    %9 = vector.shape_cast %8 : vector<2x1x256xf32> to vector<2x256xf32>
    %c0_3 = arith.constant 0 : index
    %c5 = arith.constant 5 : index
    %c0_4 = arith.constant 0 : index
    %10 = vector.load %arg1[%c0_3, %c5, %c0_4] : memref<2x9x256xf32, #tpu.memory_space<vmem>>, vector<2x4x256xf32>
    %cst_5 = arith.constant 1.000000e+00 : f32
    %11 = vector.broadcast %cst_5 : f32 to vector<2x4x256xf32>
    %12 = arith.divf %11, %10 : vector<2x4x256xf32>
    %13 = math.log %10 : vector<2x4x256xf32>
    %cst_6 = arith.constant dense<0.000000e+00> : vector<2x256xf32>
    %14 = vector.multi_reduction <add>, %13, %cst_6 [1] : vector<2x4x256xf32> to vector<2x256xf32>
    %c0_7 = arith.constant 0 : index
    %c0_8 = arith.constant 0 : index
    %c0_9 = arith.constant 0 : index
    %15 = vector.load %arg2[%c0_7, %c0_8, %c0_9] : memref<2x8x5xf32, #tpu.memory_space<vmem>>, vector<2x8x5xf32>
    %16 = vector.extract_strided_slice %15 {offsets = [0, 0, 0], sizes = [2, 8, 1], strides = [1, 1, 1]} : vector<2x8x5xf32> to vector<2x8x1xf32>
    %17 = vector.shape_cast %16 : vector<2x8x1xf32> to vector<2x8xf32>
    %cst_10 = arith.constant dense<0.000000e+00> : vector<2xf32>
    %18 = vector.multi_reduction <add>, %9, %cst_10 [1] : vector<2x256xf32> to vector<2xf32>
    %19 = vector.shape_cast %18 : vector<2xf32> to vector<2x1xf32>
    %cst_11 = arith.constant 1.000000e+00 : f32
    %20 = vector.broadcast %cst_11 : f32 to vector<2x256xf32>
    %21 = arith.subf %20, %9 : vector<2x256xf32>
    %22 = arith.mulf %9, %21 : vector<2x256xf32>
    %cst_12 = arith.constant dense<0.000000e+00> : vector<2xf32>
    %23 = vector.multi_reduction <add>, %22, %cst_12 [1] : vector<2x256xf32> to vector<2xf32>
    %24 = vector.shape_cast %23 : vector<2xf32> to vector<2x1xf32>
    %cst_13 = arith.constant 9.99999971E-10 : f32
    %25 = vector.broadcast %cst_13 : f32 to vector<2x1xf32>
    %26 = arith.addf %24, %25 : vector<2x1xf32>
    %cst_14 = arith.constant dense<0.000000e+00> : vector<2xf32>
    %27 = vector.multi_reduction <add>, %17, %cst_14 [1] : vector<2x8xf32> to vector<2xf32>
    %28 = vector.shape_cast %27 : vector<2xf32> to vector<2x1xf32>
    %29 = arith.subf %28, %19 : vector<2x1xf32>
    %30 = arith.mulf %29, %29 : vector<2x1xf32>
    %cst_15 = arith.constant 2.000000e+00 : f32
    %31 = vector.broadcast %cst_15 : f32 to vector<2x1xf32>
    %32 = arith.mulf %31, %26 : vector<2x1xf32>
    %33 = arith.divf %30, %32 : vector<2x1xf32>
    %cst_16 = arith.constant 6.28318548 : f32
    %34 = vector.broadcast %cst_16 : f32 to vector<2x1xf32>
    %35 = arith.mulf %34, %26 : vector<2x1xf32>
    %36 = math.log %35 : vector<2x1xf32>
    %cst_17 = arith.constant 5.000000e-01 : f32
    %37 = vector.broadcast %cst_17 : f32 to vector<2x1xf32>
    %38 = arith.mulf %37, %36 : vector<2x1xf32>
    %39 = arith.addf %33, %38 : vector<2x1xf32>
    %cst_18 = arith.constant 0.000000e+00 : f32
    %40 = vector.broadcast %cst_18 : f32 to vector<2x8x256xf32>
    %c0_19 = arith.constant 0 : index
    %c1 = arith.constant 1 : index
    %c0_20 = arith.constant 0 : index
    %41 = vector.load %arg1[%c0_19, %c1, %c0_20] : memref<2x9x256xf32, #tpu.memory_space<vmem>>, vector<2x1x256xf32>
    %42 = vector.shape_cast %41 : vector<2x1x256xf32> to vector<2x256xf32>
    %43 = vector.broadcast %7 : vector<1x256xf32> to vector<2x256xf32>
    %44 = arith.addf %42, %43 : vector<2x256xf32>
    %45 = vector.extract_strided_slice %15 {offsets = [0, 0, 1], sizes = [2, 8, 1], strides = [1, 1, 1]} : vector<2x8x5xf32> to vector<2x8x1xf32>
    %46 = vector.shape_cast %44 : vector<2x256xf32> to vector<2x1x256xf32>
    %47 = vector.broadcast %45 : vector<2x8x1xf32> to vector<2x8x256xf32>
    %48 = vector.broadcast %46 : vector<2x1x256xf32> to vector<2x8x256xf32>
    %49 = arith.subf %47, %48 : vector<2x8x256xf32>
    %50 = vector.extract_strided_slice %12 {offsets = [0, 0, 0], sizes = [2, 1, 256], strides = [1, 1, 1]} : vector<2x4x256xf32> to vector<2x1x256xf32>
    %51 = vector.shape_cast %50 : vector<2x1x256xf32> to vector<2x256xf32>
    %52 = vector.shape_cast %51 : vector<2x256xf32> to vector<2x1x256xf32>
    %53 = vector.broadcast %52 : vector<2x1x256xf32> to vector<2x8x256xf32>
    %54 = arith.mulf %49, %53 : vector<2x8x256xf32>
    %55 = arith.mulf %54, %54 : vector<2x8x256xf32>
    %56 = arith.addf %40, %55 : vector<2x8x256xf32>
    %c0_21 = arith.constant 0 : index
    %c2 = arith.constant 2 : index
    %c0_22 = arith.constant 0 : index
    %57 = vector.load %arg1[%c0_21, %c2, %c0_22] : memref<2x9x256xf32, #tpu.memory_space<vmem>>, vector<2x1x256xf32>
    %58 = vector.shape_cast %57 : vector<2x1x256xf32> to vector<2x256xf32>
    %59 = vector.broadcast %4 : vector<1x256xf32> to vector<2x256xf32>
    %60 = arith.addf %58, %59 : vector<2x256xf32>
    %61 = vector.extract_strided_slice %15 {offsets = [0, 0, 2], sizes = [2, 8, 1], strides = [1, 1, 1]} : vector<2x8x5xf32> to vector<2x8x1xf32>
    %62 = vector.shape_cast %60 : vector<2x256xf32> to vector<2x1x256xf32>
    %63 = vector.broadcast %61 : vector<2x8x1xf32> to vector<2x8x256xf32>
    %64 = vector.broadcast %62 : vector<2x1x256xf32> to vector<2x8x256xf32>
    %65 = arith.subf %63, %64 : vector<2x8x256xf32>
    %66 = vector.extract_strided_slice %12 {offsets = [0, 1, 0], sizes = [2, 1, 256], strides = [1, 1, 1]} : vector<2x4x256xf32> to vector<2x1x256xf32>
    %67 = vector.shape_cast %66 : vector<2x1x256xf32> to vector<2x256xf32>
    %68 = vector.shape_cast %67 : vector<2x256xf32> to vector<2x1x256xf32>
    %69 = vector.broadcast %68 : vector<2x1x256xf32> to vector<2x8x256xf32>
    %70 = arith.mulf %65, %69 : vector<2x8x256xf32>
    %71 = arith.mulf %70, %70 : vector<2x8x256xf32>
    %72 = arith.addf %56, %71 : vector<2x8x256xf32>
    %c0_23 = arith.constant 0 : index
    %c3 = arith.constant 3 : index
    %c0_24 = arith.constant 0 : index
    %73 = vector.load %arg1[%c0_23, %c3, %c0_24] : memref<2x9x256xf32, #tpu.memory_space<vmem>>, vector<2x1x256xf32>
    %74 = vector.shape_cast %73 : vector<2x1x256xf32> to vector<2x256xf32>
    %75 = vector.extract_strided_slice %15 {offsets = [0, 0, 3], sizes = [2, 8, 1], strides = [1, 1, 1]} : vector<2x8x5xf32> to vector<2x8x1xf32>
    %76 = vector.shape_cast %74 : vector<2x256xf32> to vector<2x1x256xf32>
    %77 = vector.broadcast %75 : vector<2x8x1xf32> to vector<2x8x256xf32>
    %78 = vector.broadcast %76 : vector<2x1x256xf32> to vector<2x8x256xf32>
    %79 = arith.subf %77, %78 : vector<2x8x256xf32>
    %80 = vector.extract_strided_slice %12 {offsets = [0, 2, 0], sizes = [2, 1, 256], strides = [1, 1, 1]} : vector<2x4x256xf32> to vector<2x1x256xf32>
    %81 = vector.shape_cast %80 : vector<2x1x256xf32> to vector<2x256xf32>
    %82 = vector.shape_cast %81 : vector<2x256xf32> to vector<2x1x256xf32>
    %83 = vector.broadcast %82 : vector<2x1x256xf32> to vector<2x8x256xf32>
    %84 = arith.mulf %79, %83 : vector<2x8x256xf32>
    %85 = arith.mulf %84, %84 : vector<2x8x256xf32>
    %86 = arith.addf %72, %85 : vector<2x8x256xf32>
    %c0_25 = arith.constant 0 : index
    %c4 = arith.constant 4 : index
    %c0_26 = arith.constant 0 : index
    %87 = vector.load %arg1[%c0_25, %c4, %c0_26] : memref<2x9x256xf32, #tpu.memory_space<vmem>>, vector<2x1x256xf32>
    %88 = vector.shape_cast %87 : vector<2x1x256xf32> to vector<2x256xf32>
    %89 = vector.extract_strided_slice %15 {offsets = [0, 0, 4], sizes = [2, 8, 1], strides = [1, 1, 1]} : vector<2x8x5xf32> to vector<2x8x1xf32>
    %90 = vector.shape_cast %88 : vector<2x256xf32> to vector<2x1x256xf32>
    %91 = vector.broadcast %89 : vector<2x8x1xf32> to vector<2x8x256xf32>
    %92 = vector.broadcast %90 : vector<2x1x256xf32> to vector<2x8x256xf32>
    %93 = arith.subf %91, %92 : vector<2x8x256xf32>
    %94 = vector.extract_strided_slice %12 {offsets = [0, 3, 0], sizes = [2, 1, 256], strides = [1, 1, 1]} : vector<2x4x256xf32> to vector<2x1x256xf32>
    %95 = vector.shape_cast %94 : vector<2x1x256xf32> to vector<2x256xf32>
    %96 = vector.shape_cast %95 : vector<2x256xf32> to vector<2x1x256xf32>
    %97 = vector.broadcast %96 : vector<2x1x256xf32> to vector<2x8x256xf32>
    %98 = arith.mulf %93, %97 : vector<2x8x256xf32>
    %99 = arith.mulf %98, %98 : vector<2x8x256xf32>
    %100 = arith.addf %86, %99 : vector<2x8x256xf32>
    %cst_27 = arith.constant -5.000000e-01 : f32
    %101 = vector.broadcast %cst_27 : f32 to vector<2x8x256xf32>
    %102 = arith.mulf %101, %100 : vector<2x8x256xf32>
    %103 = vector.shape_cast %14 : vector<2x256xf32> to vector<2x1x256xf32>
    %104 = vector.broadcast %103 : vector<2x1x256xf32> to vector<2x8x256xf32>
    %105 = arith.subf %102, %104 : vector<2x8x256xf32>
    %cst_28 = arith.constant 3.67575407 : f32
    %106 = vector.broadcast %cst_28 : f32 to vector<2x8x256xf32>
    %107 = arith.subf %105, %106 : vector<2x8x256xf32>
    %cst_29 = arith.constant 9.99999971E-10 : f32
    %108 = vector.broadcast %cst_29 : f32 to vector<2x256xf32>
    %109 = arith.addf %9, %108 : vector<2x256xf32>
    %110 = math.log %109 : vector<2x256xf32>
    %cst_30 = arith.constant 9.99999971E-10 : f32
    %111 = vector.broadcast %cst_30 : f32 to vector<2x1xf32>
    %112 = arith.addf %19, %111 : vector<2x1xf32>
    %113 = math.log %112 : vector<2x1xf32>
    %114 = vector.broadcast %113 : vector<2x1xf32> to vector<2x256xf32>
    %115 = arith.subf %110, %114 : vector<2x256xf32>
    %116 = vector.shape_cast %115 : vector<2x256xf32> to vector<2x1x256xf32>
    %117 = vector.broadcast %116 : vector<2x1x256xf32> to vector<2x8x256xf32>
    %118 = arith.addf %107, %117 : vector<2x8x256xf32>
    %cst_31 = arith.constant dense<0xFF800000> : vector<2x8xf32>
    %119 = vector.multi_reduction <maximumf>, %118, %cst_31 [2] : vector<2x8x256xf32> to vector<2x8xf32>
    %120 = vector.shape_cast %119 : vector<2x8xf32> to vector<2x8x1xf32>
    %121 = vector.broadcast %120 : vector<2x8x1xf32> to vector<2x8x256xf32>
    %122 = arith.subf %118, %121 : vector<2x8x256xf32>
    %123 = math.exp %122 : vector<2x8x256xf32>
    %cst_32 = arith.constant dense<0.000000e+00> : vector<2x8xf32>
    %124 = vector.multi_reduction <add>, %123, %cst_32 [2] : vector<2x8x256xf32> to vector<2x8xf32>
    %125 = vector.shape_cast %124 : vector<2x8xf32> to vector<2x8x1xf32>
    %126 = math.log %125 : vector<2x8x1xf32>
    %127 = arith.addf %120, %126 : vector<2x8x1xf32>
    %128 = vector.shape_cast %127 : vector<2x8x1xf32> to vector<2x8xf32>
    %129 = arith.mulf %17, %128 : vector<2x8xf32>
    %cst_33 = arith.constant dense<0.000000e+00> : vector<2xf32>
    %130 = vector.multi_reduction <add>, %129, %cst_33 [1] : vector<2x8xf32> to vector<2xf32>
    %131 = vector.shape_cast %130 : vector<2xf32> to vector<2x1xf32>
    %cst_34 = arith.constant 0.000000e+00 : f32
    %132 = vector.broadcast %cst_34 : f32 to vector<2x1xf32>
    %133 = arith.subf %132, %131 : vector<2x1xf32>
    %134 = arith.addf %39, %133 : vector<2x1xf32>
    %135 = vector.shape_cast %134 : vector<2x1xf32> to vector<1x2x1xf32>
    %cst_35 = arith.constant dense<0.000000e+00> : vector<1xf32>
    %136 = vector.multi_reduction <add>, %135, %cst_35 [1, 2] : vector<1x2x1xf32> to vector<1xf32>
    %137 = vector.shape_cast %136 : vector<1xf32> to vector<1x1x1xf32>
    %138 = vector.extract %137[0, 0, 0] : f32 from vector<1x1x1xf32>
    %139 = vector.broadcast %138 : f32 to vector<1x1x128xf32>
    %c0_36 = arith.constant 0 : index
    %c0_37 = arith.constant 0 : index
    %c0_38 = arith.constant 0 : index
    %140 = vector.load %arg3[%c0_36, %c0_37, %c0_38] : memref<1x1x128xf32, #tpu.memory_space<vmem>>, vector<1x1x128xf32>
    tpu.vector_store %arg3[%c0_36, %c0_37, %c0_38], %139 {strides = array<i32>} : memref<1x1x128xf32, #tpu.memory_space<vmem>>, vector<1x1x128xf32>,
    return
  }
  func.func @transform_0(%arg0: i32) -> (i32, i32, i32) {
    %c0_i32 = arith.constant 0 : i32
    %c0_i32_0 = arith.constant 0 : i32
    %c0_i32_1 = arith.constant 0 : i32
    return %arg0, %c0_i32, %c0_i32_0 : i32, i32, i32
  }
  func.func @transform_1(%arg0: i32) -> (i32, i32, i32) {
    %c0_i32 = arith.constant 0 : i32
    %c0_i32_0 = arith.constant 0 : i32
    %c0_i32_1 = arith.constant 0 : i32
    return %arg0, %c0_i32, %c0_i32_0 : i32, i32, i32
  }
  func.func @transform_2(%arg0: i32) -> (i32, i32, i32) {
    %c0_i32 = arith.constant 0 : i32
    %c0_i32_0 = arith.constant 0 : i32
    %c0_i32_1 = arith.constant 0 : i32
    return %arg0, %c0_i32, %c0_i32_0 : i32, i32, i32
  }
}

</mosaic_0001>

<bundles_post_ra>
// kernel: single_frame_gmm_loss.1
= control target key start
LH: loop header
LB: loop body
LE: loop exit
PB: predicated region body
PF: predicated region fallthrough
CT: control target
= control target key end

     0   :  { %v11_v0 = vlaneseq  ;;  %v763_v1 = vmov 1   ;;  %v764_v5 = vmov 1966171168   ;;  %v765_v11 = vmov 2   ;;  %s1080_s1 = inlined_call_operand.vmem [shape: f32[2,8,5], index: 1, kind: input, shape index: {}]   ;;  %s1081_s0 = inlined_call_operand.vmem [shape: f32[2,9,256], index: 0, kind: input, shape index: {}]   ;;  %s1082_s2 = inlined_call_operand.vmem [shape: f32[1,1,128], index: 2, kind: output, shape index: {}]  }
   0x1   :  { %703 = vset.pattern.permute.xlu1 %v763_v1  ;;  %v787_v2 = vld [vmem:[%s1080_s1 + $0x8] sm:$0xff]  ;;  %702 = vset.pattern.permute.xlu0 %v763_v1  ;;  %v128_v6 = vunpack.c.l.s4 %v764_v5  ;;  %v805_v8 = vld [vmem:[%s1080_s1] sm:$0xff]  ;;  %vm151_vm0 = vcmask 1041408   ;;  %v766_v18 = vmov 3   ;;  %v767_v21 = vmov 4  }
   0x2   :  { %v792_v3 = vld [vmem:[%s1081_s0] ss:$8 sm:$0x3]  ;;  %265 = vperm.xlu1 %703, %v787_v2   ;;  %v800_v7 = vshrl.u32 %v11_v0, 7  ;;  %v824_v22 = vand.u32 127, %v11_v0  ;;  %vm76_vm1 = vcmask 1042432  }
   0x3   :  { %v798_v4 = vld [vmem:[%s1081_s0 + $0x20] ss:$8 sm:$0x3]  ;;  %v129_v10 = vunpack.c.0.s8 %v128_v6  ;;  %v831_v30 = vld [vmem:[%s1081_s0 + $0x30] sm:$0x1]  ;;  %vm93_vm2 = vcmask 1043456  }
   0x4   :  { %v126_v9 = vcombine.low %v792_v3, %v798_v4  ;;  %v13_v23 = vadd.s32 128, %v824_v22  ;;  %v14_v24 = vcvt.s32.f32 %v824_v22  ;;  %v32_v33 = vld [vmem:[%s1081_s0 + $0x20] sm:$0xe0]  ;;  %v33_v34 = vld [vmem:[%s1081_s0 + $0x28] sm:$0xe0]  ;;  %709 = vlog2.f32 %v831_v30 }
   0x5   :  { %v811_v12 = vsub.s32 %v129_v10, %v800_v7  ;;  %v843_v35 = vld [vmem:[%s1081_s0 + $0x38] sm:$0x1]  ;;  %711 = vlog2.f32 %v32_v33  ;;  %v848_v38 = vld [vmem:[%s1081_s0 + $0x10] sm:$0x1]  ;;  %v28_v42 = vld [vmem:[%s1081_s0] sm:$0xe0] }
   0x6   :  { %704 = vset.pattern.permute.xlu1 %v765_v11  ;;  %v15_v25 = vcvt.s32.f32 %v13_v23  ;;  %v17_v26 = vmul.f32 0.0625, %v14_v24  ;;  %713 = vrcp.f32 %v32_v33  ;;  %v853_v39 = vld [vmem:[%s1081_s0 + $0x18] sm:$0x1]  ;;  %v29_v43 = vld [vmem:[%s1081_s0 + $0x8] sm:$0xe0]  ;;  %v881_v58 = vsub.s32 5, %v800_v7 }
   0x7   :  { %356 = vperm.xlu1 %704, %v805_v8   ;;  %v133_v13 = vrot.slane %v126_v9, %v811_v12  ;;  %715 = vrcp.f32 %v33_v34  ;;  %v884_v59 = vsub.s32 6, %v800_v7  ;;  %v685_v0 = vld [vmem:[%s1081_s0 + $0x22] ss:$8 sm:$0x3]  ;;  %vm210_vm3 = vcmask 1041409  }
   0x8   :  { %v18_v27 = vmul.f32 0.0625, %v15_v25  ;;  %v19_v28 = vfloor.f32 %v17_v26  ;;  %717 = vlog2.f32 %v843_v35  ;;  %vm213_vm4 = vcmask 58368  }
   0x9   :  { %v134_v14 = vcombine.high %v133_v13, %v133_v13  ;;  %v141_v15 = vrot.slane %v133_v13, %v811_v12  ;;  %719 = vlog2.f32 %v33_v34  ;;  %v894_v13 = vsub.s32 0, %v800_v7 }
   0xa   :  { %v20_v29 = vfloor.f32 %v18_v27  ;;  %v21_v31 = vmul.f32 16.0, %v19_v28  ;;  %721 = vlog2.f32 %v848_v38  ;;  %vm664_vm5 = vcmask 1024  }
   0xb   :  { %360 = vperm.xlu1 %704, %v787_v2   ;;  %v148_v16 = vrot.slane %v134_v14, %v811_v12  ;;  %v152_v17 = vsel %vm151_vm0, %v141_v15, 0.0  ;;  %723 = vlog2.f32 %v853_v39  ;;  %v897_v14 = vsub.s32 1, %v800_v7  ;;  %v683_v15 = vld [vmem:[%s1081_s0 + $0x21] ss:$8 sm:$0x3] }
   0xc   :  { %v22_v32 = vmul.f32 16.0, %v20_v29  ;;  %v23_v36 = vsub.f32 %v14_v24, %v21_v31  ;;  %v328_v40 = vcombine.low %v19_v28, %v20_v29  ;;  %725 = vlog2.f32 %v28_v42 }
   0xd   :  { %v153_v19 = vsel %vm151_vm0, %v148_v16, 0.0  ;;  %727 = vlog2.f32 %v29_v43 }
   0xe   :  { %v154_v20 = vadd.f32 %v153_v19, %v152_v17  ;;  %v24_v37 = vsub.f32 %v15_v25, %v22_v32  ;;  %v865_v44 = vrot.slane %v328_v40, %v811_v12  ;;  %v710_v45 = vpop.eup %709  ;;  %729 = vrcp.f32 %v28_v42  ;;  %v684_v40 = vld [vmem:[%s1081_s0 + $0x2] ss:$8 sm:$0x3] }
   0xf   :  { %705 = vset.pattern.permute.xlu1 %v766_v18  ;;  %v712_v46 = vpop.eup %711  ;;  %v65_v54 = vmul.f32 0.6931472, %v710_v45  ;;  %731 = vrcp.f32 %v29_v43 }
  0x10   :  { %422 = vperm.xlu1 %705, %v805_v8   ;;  %155 = vadd.xlane.f32.xlu0 %v154_v20  ;;  %v233_v41 = vcombine.low %v23_v36, %v24_v37  ;;  %v870_v48 = vpop.eup %713  ;;  %v336_v51 = vcombine.high %v865_v44, %v865_v44  ;;  %v61_v53 = vmul.f32 0.6931472, %v712_v46  ;;  %733 = vrcp.f32 %v831_v30 }
  0x11   :  { %v874_v50 = vpop.eup %715  ;;  %v84_v5 = vrot.slane %v65_v54, 5  ;;  %v305_v16 = vrot.slane %v870_v48, %v881_v58  ;;  %v400_v17 = vrot.slane %v870_v48, %v884_v59  ;;  %v343_v33 = vrot.slane %v865_v44, %v811_v12 }
  0x12   :  { %v868_v47 = vrot.slane %v233_v41, %v811_v12  ;;  %v718_v52 = vpop.eup %717  ;;  %v350_v62 = vrot.slane %v336_v51, %v811_v12  ;;  %v83_v1 = vrot.slane %v61_v53, 5  ;;  %v309_v18 = vrot.slane %v874_v50, %v881_v58 }
  0x13   :  { %v720_v55 = vpop.eup %719  ;;  %v67_v11 = vmul.f32 0.6931472, %v718_v52  ;;  %v404_v34 = vrot.slane %v874_v50, %v884_v59  ;;  %v922_v36 = vsub.s32 7, %v800_v7  ;;  %735 = vrcp.f32 %v843_v35 }
  0x14   :  { %426 = vperm.xlu1 %705, %v787_v2   ;;  %v241_v56 = vcombine.high %v868_v47, %v868_v47  ;;  %v722_v57 = vpop.eup %721  ;;  %v63_v10 = vmul.f32 0.6931472, %v720_v55  ;;  %v354_v20 = vadd.f32 %v685_v0, %v350_v62  ;;  %v85_v25 = vsel %vm76_vm1, %v83_v1, %v84_v5  ;;  %v687_v0 = vld [vmem:[%s1081_s0 + $0x23] ss:$8 sm:$0x3] }
  0x15   :  { %v724_v60 = vpop.eup %723  ;;  %v57_v23 = vmul.f32 0.6931472, %v722_v57  ;;  %v87_v32 = vrot.slane %v67_v11, 5  ;;  %v108_v43 = vsel %vm93_vm2, %v85_v25, 0.0  ;;  %737 = vrcp.f32 %v848_v38 }
  0x16   :  { %v726_v63 = vpop.eup %725  ;;  %v255_v9 = vrot.slane %v241_v56, %v811_v12  ;;  %v59_v28 = vmul.f32 0.6931472, %v724_v60  ;;  %v86_v31 = vrot.slane %v63_v10, 5  ;;  %v376_v41 = vrot.slane %v354_v20, %v894_v13  ;;  %v962_v38 = vld [vmem:[%s1081_s0 + $0x4] ss:$8 sm:$0x3] }
  0x17   :  { %v728_v6 = vpop.eup %727  ;;  %v53_v26 = vmul.f32 0.6931472, %v726_v63  ;;  %v78_v35 = vrot.slane %v57_v23, 5  ;;  %v380_v54 = vrot.slane %v354_v20, %v897_v14  ;;  %v942_v56 = vadd.f32 %v684_v40, %v343_v33 }
  0x18   :  { %706 = vset.pattern.permute.xlu1 %v767_v21  ;;  %v911_v21 = vld [vmem:[%s1081_s0 + $0x3] ss:$8 sm:$0x3]  ;;  %v913_v24 = vpop.eup %729  ;;  %v55_v27 = vmul.f32 0.6931472, %v728_v6  ;;  %v259_v29 = vadd.f32 %v683_v15, %v255_v9  ;;  %v81_v51 = vrot.slane %v59_v28, 5  ;;  %v88_v55 = vsel %vm76_vm1, %v86_v31, %v87_v32 }
  0x19   :  { %488 = vperm.xlu1 %706, %v805_v8   ;;  %v925_v37 = vpop.eup %731  ;;  %v434_v42 = vrot.slane %v911_v21, %v894_v13  ;;  %v77_v45 = vrot.slane %v53_v26, 5  ;;  %v438_v60 = vrot.slane %v911_v21, %v897_v14  ;;  %v466_v1 = vrot.slane %v870_v48, %v922_v36 }
  0x1a   :  { %v80_v46 = vrot.slane %v55_v27, 5  ;;  %v281_v52 = vrot.slane %v259_v29, %v894_v13  ;;  %v285_v53 = vrot.slane %v259_v29, %v897_v14  ;;  %v109_v5 = vrot.slane %v108_v43, 4  ;;  %v734_v31 = vpop.eup %733 }
  0x1b   :  { %739 = vrcp.f32 %v853_v39  ;;  %v115_v9 = vsel %vm93_vm2, %v88_v55, 0.0  ;;  %v79_v10 = vsel %vm76_vm1, %v77_v45, %v78_v35  ;;  %v689_v39 = vld [vmem:[%s1081_s0 + $0x24] ss:$8 sm:$0x3]  ;;  %v368_v26 = vrot.slane %v942_v56, %v894_v13 }
  0x1c   :  { %v82_v11 = vsel %vm76_vm1, %v80_v46, %v81_v51  ;;  %v442_v27 = vrot.slane %v687_v0, %v894_v13  ;;  %v446_v28 = vrot.slane %v687_v0, %v897_v14  ;;  %v470_v29 = vrot.slane %v874_v50, %v922_v36 }
  0x1d   :  { %492 = vperm.xlu1 %706, %v787_v2   ;;  %v110_v32 = vadd.f32 %v109_v5, %v108_v43  ;;  %v562_v33 = vadd.f32 1e-09, %v798_v4  ;;  %v736_v40 = vpop.eup %735  ;;  %v116_v45 = vrot.slane %v115_v9, 4  ;;  %v94_v35 = vsel %vm93_vm2, %v79_v10, 0.0 }
  0x1e   :  { %v101_v46 = vsel %vm93_vm2, %v82_v11, 0.0  ;;  %v512_v5 = vrot.slane %v689_v39, %v897_v14  ;;  %v532_v10 = vrot.slane %v734_v31, %v894_v13  ;;  %v536_v11 = vrot.slane %v736_v40, %v894_v13 }
  0x1f   :  { %v248_v50 = vrot.slane %v868_v47, %v811_v12  ;;  %741 = vlog2.f32 %v562_v33  ;;  %v1003_v48 = vpop.eup %737  ;;  %v504_v47 = vrot.slane %v962_v38, %v897_v14  ;;  %v1083_v21 = vrot.slane %v913_v24, %v884_v59 }
  0x26   :  { %261 = vperm.xlu0 %702, %v805_v8  }
  0x81   :  { %v872_v49 = vpop.permute.xlu1 %265 }
  0x82   :  { %v292_v15 = vsub.f32 %v872_v49, %v281_v52  ;;  %v293_v20 = vsub.f32 %v872_v49, %v285_v53  ;;  %v372_v49 = vrot.slane %v942_v56, %v897_v14 }
  0x84   :  { %v312_v51 = vmul.f32 %v305_v16, %v292_v15  ;;  %v313_v52 = vmul.f32 %v309_v18, %v293_v20  ;;  %v682_v16 = vld [vmem:[%s1081_s0 + $0x1] ss:$8 sm:$0x3]  ;;  %v111_v18 = vrot.slane %v110_v32, 2  ;;  %v561_v15 = vadd.f32 1e-09, %v792_v3 }
  0x85   :  { %v258_v33 = vadd.f32 %v682_v16, %v248_v50 }
  0x86   :  { %v886_v61 = vpop.permute.xlu1 %356  ;;  %v316_v20 = vmul.f32 %v312_v51, %v312_v51  ;;  %743 = vlog2.f32 %v561_v15 }
  0x87   :  { %v273_v16 = vrot.slane %v258_v33, %v894_v13 }
  0x8a   :  { %v361_v19 = vpop.permute.xlu1 %360 }
  0x8b   :  { %v387_v23 = vsub.f32 %v361_v19, %v376_v41  ;;  %v388_v25 = vsub.f32 %v361_v19, %v380_v54  ;;  %v500_v19 = vrot.slane %v962_v38, %v894_v13  ;;  %v508_v41 = vrot.slane %v689_v39, %v894_v13 }
  0x8d   :  { %v407_v43 = vmul.f32 %v400_v17, %v387_v23  ;;  %v408_v53 = vmul.f32 %v404_v34, %v388_v25  ;;  %v117_v17 = vadd.f32 %v116_v45, %v115_v9  ;;  %v95_v34 = vrot.slane %v94_v35, 4 }
  0x8e   :  { %v317_v23 = vmul.f32 %v313_v52, %v313_v52  ;;  %v524_v9 = vrot.slane %v1003_v48, %v894_v13  ;;  %v112_v45 = vadd.f32 %v111_v18, %v110_v32  ;;  %v386_v18 = vsub.f32 %v886_v61, %v372_v49 }
  0x8f   :  { %v936_v44 = vpop.permute.xlu1 %422  ;;  %v411_v25 = vmul.f32 %v407_v43, %v407_v43  ;;  %v412_v39 = vmul.f32 %v408_v53, %v408_v53  ;;  %v118_v52 = vrot.slane %v117_v17, 2  ;;  %v96_v43 = vadd.f32 %v95_v34, %v94_v35 }
  0x90   :  { %v297_v48 = vrot.slane %v913_v24, %v881_v58  ;;  %v301_v49 = vrot.slane %v925_v37, %v881_v58 }
  0x91   :  { %v97_v35 = vrot.slane %v96_v43, 2 }
  0x93   :  { %v427_v6 = vpop.permute.xlu1 %426 }
  0x94   :  { %v453_v55 = vsub.f32 %v427_v6, %v442_v27  ;;  %v454_v0 = vsub.f32 %v427_v6, %v446_v28  ;;  %v102_v6 = vrot.slane %v101_v46, 4  ;;  %v740_v28 = vpop.eup %739 }
  0x95   :  { %v528_v53 = vrot.slane %v740_v28, %v894_v13  ;;  %v742_v50 = vpop.eup %741 }
  0x96   :  { %v473_v31 = vmul.f32 %v466_v1, %v453_v55  ;;  %v474_v40 = vmul.f32 %v470_v29, %v454_v0  ;;  %v103_v29 = vadd.f32 %v102_v6, %v101_v46  ;;  %v416_v55 = vadd.f32 %v412_v39, %v317_v23 }
  0x97   :  { %v385_v46 = vsub.f32 %v886_v61, %v368_v26 }
  0x98   :  { %v489_v54 = vpop.permute.xlu1 %488  ;;  %v477_v0 = vmul.f32 %v473_v31, %v473_v31  ;;  %v104_v34 = vrot.slane %v103_v29, 2  ;;  %v566_v31 = vmul.f32 0.6931472, %v742_v50 }
  0x99   :  { %v517_v61 = vsub.f32 %v489_v54, %v500_v19  ;;  %v518_v56 = vsub.f32 %v489_v54, %v504_v47  ;;  %v1085_v54 = vrot.slane %v913_v24, %v922_v36  ;;  %v744_v47 = vpop.eup %743 }
  0x9c   :  { %v493_v27 = vpop.permute.xlu1 %492 }
  0x9d   :  { %v519_v63 = vsub.f32 %v493_v27, %v508_v41  ;;  %v520_v62 = vsub.f32 %v493_v27, %v512_v5  ;;  %v1010_v51 = vpop.xlane.xlu0 %155  ;;  %v415_v41 = vadd.f32 %v411_v25, %v316_v20  ;;  %v478_v5 = vmul.f32 %v474_v40, %v474_v40 }
  0x9e   :  { %v567_v1 = vadd.f32 1e-09, %v1010_v51  ;;  %v98_v25 = vadd.f32 %v97_v35, %v96_v43  ;;  %v1086_v27 = vrot.slane %v925_v37, %v922_v36  ;;  %v105_v40 = vadd.f32 %v104_v34, %v103_v29 }
  0x9f   :  { %v539_v57 = vmul.f32 %v532_v10, %v519_v63  ;;  %v540_v30 = vmul.f32 %v536_v11, %v520_v62  ;;  %v277_v63 = vrot.slane %v258_v33, %v897_v14  ;;  %v113_v62 = vrot.slane %v112_v45, 1 }
  0xa0   :  { %745 = vlog2.f32 %v567_v1  ;;  %v119_v11 = vadd.f32 %v118_v52, %v117_v17  ;;  %v481_v26 = vadd.f32 %v477_v0, %v415_v41  ;;  %v482_v17 = vadd.f32 %v478_v5, %v416_v55 }
  0xa1   :  { %v543_v32 = vmul.f32 %v539_v57, %v539_v57  ;;  %v544_v10 = vmul.f32 %v540_v30, %v540_v30  ;;  %v451_v30 = vsub.f32 %v936_v44, %v434_v42  ;;  %v452_v57 = vsub.f32 %v936_v44, %v438_v60 }
  0xa2   :  { %v114_v6 = vadd.f32 %v113_v62, %v112_v45  ;;  %v120_v42 = vrot.slane %v119_v11, 1  ;;  %v405_v44 = vmul.f32 %v1083_v21, %v385_v46  ;;  %v1084_v60 = vrot.slane %v925_v37, %v884_v59 }
  0xa3   :  { %v547_v15 = vadd.f32 %v543_v32, %v481_v26  ;;  %v548_v20 = vadd.f32 %v544_v10, %v482_v17  ;;  %v471_v58 = vmul.f32 %v1085_v54, %v451_v30  ;;  %v472_v28 = vmul.f32 %v1086_v27, %v452_v57 }
  0xa4   :  { %v406_v39 = vmul.f32 %v1084_v60, %v386_v18  ;;  %v537_v33 = vmul.f32 %v524_v9, %v517_v61  ;;  %v538_v45 = vmul.f32 %v528_v53, %v518_v56  ;;  %v121_v41 = vadd.f32 %v120_v42, %v119_v11 }
  0xa5   :  { %v262_v23 = vpop.permute.xlu0 %261  ;;  %v551_v1 = vmul.f32 -0.5, %v547_v15  ;;  %v552_v59 = vmul.f32 -0.5, %v548_v20  ;;  %v99_v55 = vrot.slane %v98_v25, 1  ;;  %v409_v5 = vmul.f32 %v405_v44, %v405_v44 }
  0xa6   :  { %v290_v38 = vsub.f32 %v262_v23, %v273_v16  ;;  %v291_v19 = vsub.f32 %v262_v23, %v277_v63  ;;  %v410_v16 = vmul.f32 %v406_v39, %v406_v39  ;;  %v475_v62 = vmul.f32 %v471_v58, %v471_v58 }
  0xa7   :  { %v476_v32 = vmul.f32 %v472_v28, %v472_v28  ;;  %v106_v37 = vrot.slane %v105_v40, 1  ;;  %v541_v10 = vmul.f32 %v537_v33, %v537_v33  ;;  %v542_v29 = vmul.f32 %v538_v45, %v538_v45 }
  0xa8   :  { %v310_v52 = vmul.f32 %v297_v48, %v290_v38  ;;  %v311_v43 = vmul.f32 %v301_v49, %v291_v19  ;;  %v555_v50 = vsub.f32 %v551_v1, %v114_v6  ;;  %v556_v46 = vsub.f32 %v552_v59, %v121_v41 }
  0xa9   :  { %v564_v34 = vmul.f32 0.6931472, %v744_v47  ;;  %v100_v57 = vadd.f32 %v99_v55, %v98_v25  ;;  %v107_v26 = vadd.f32 %v106_v37, %v105_v40  ;;  %v768_v40 = vmov 0  }
  0xaa   :  { %v746_v0 = vpop.eup %745  ;;  %v314_v24 = vmul.f32 %v310_v52, %v310_v52  ;;  %v315_v63 = vmul.f32 %v311_v43, %v311_v43  ;;  %v692_v56 = vadd.f32 -3.675754, %v555_v50  ;;  %v693_v49 = vadd.f32 -3.675754, %v556_v46  ;;  %707 = vset.pattern.permute.xlu1 %v768_v40  ;;  %708 = vset.pattern.permute.xlu0 %v768_v40 }
  0xab   :  { %v569_v36 = vmul.f32 0.6931472, %v746_v0 }
  0xac   :  { %v413_v35 = vadd.f32 %v409_v5, %v314_v24  ;;  %v414_v9 = vadd.f32 %v410_v16, %v315_v63 }
  0xad   :  { %v578_v53 = vrot.slane %v569_v36, %v897_v14  ;;  %v574_v11 = vrot.slane %v569_v36, %v894_v13 }
  0xae   :  { %v479_v18 = vadd.f32 %v475_v62, %v413_v35  ;;  %v480_v48 = vadd.f32 %v476_v32, %v414_v9  ;;  %v204_v32 = vsub.s32 %v824_v22, %v800_v7 }
  0xaf   :  { %v582_v30 = vsub.f32 %v566_v31, %v578_v53  ;;  %v581_v6 = vsub.f32 %v564_v34, %v574_v11 }
  0xb0   :  { %v545_v17 = vadd.f32 %v541_v10, %v479_v18  ;;  %v546_v61 = vadd.f32 %v542_v29, %v480_v48 }
  0xb1   :  { %v596_v15 = vrot.slane %v582_v30, %v894_v13  ;;  %v600_v20 = vrot.slane %v582_v30, %v897_v14  ;;  %v588_v25 = vrot.slane %v581_v6, %v894_v13  ;;  %v592_v58 = vrot.slane %v581_v6, %v897_v14 }
  0xb2   :  { %v549_v23 = vmul.f32 -0.5, %v545_v17  ;;  %v550_v42 = vmul.f32 -0.5, %v546_v61  ;;  %v157_v30 = vsub.f32 1.0, %v792_v3 }
  0xb3   :  { %v607_v21 = vadd.f32 %v692_v56, %v596_v15  ;;  %v608_v44 = vadd.f32 %v693_v49, %v600_v20 }
  0xb4   :  { %v553_v60 = vsub.f32 %v549_v23, %v100_v57  ;;  %v554_v39 = vsub.f32 %v550_v42, %v107_v26  ;;  %v158_v57 = vsub.f32 1.0, %v798_v4  ;;  %v159_v26 = vmul.f32 %v157_v30, %v792_v3 }
  0xb5   :  { %v612_v38 = vmax.f32 %v607_v21, %v608_v44 }
  0xb6   :  { %v690_v19 = vadd.f32 -3.675754, %v553_v60  ;;  %v691_v54 = vadd.f32 -3.675754, %v554_v39  ;;  %v160_v17 = vmul.f32 %v798_v4, %v158_v57 }
  0xb7   :  { %613 = vmax.xlane.f32.xlu0 %v612_v38 }
  0xb8   :  { %v605_v27 = vadd.f32 %v690_v19, %v588_v25  ;;  %v606_v28 = vadd.f32 %v691_v54, %v592_v58  ;;  %v163_v61 = vcombine.low %v159_v26, %v160_v17 }
  0xba   :  { %v609_v31 = vmax.f32 %v605_v27, %v606_v28  ;;  %v170_v56 = vrot.slane %v163_v61, %v811_v12 }
  0xbc   :  { %610 = vmax.xlane.f32.xlu1 %v609_v31  ;;  %v171_v49 = vcombine.high %v170_v56, %v170_v56  ;;  %v178_v15 = vrot.slane %v170_v56, %v811_v12 }
  0xbe   :  { %v188_v20 = vsel %vm151_vm0, %v178_v15, 0.0 }
  0xcd   :  { %200 = vperm.xlu0 %708, %v787_v2  }
 0x144   :  { %v614_v47 = vpop.xlane.xlu0 %613 }
 0x145   :  { %v617_v33 = vsub.f32 %v607_v21, %v614_v47  ;;  %v618_v45 = vsub.f32 %v608_v44, %v614_v47 }
 0x147   :  { %v623_v59 = vmul.f32 1.442695, %v617_v33  ;;  %v625_v14 = vmul.f32 1.442695, %v618_v45 }
 0x149   :  { %v611_v52 = vpop.xlane.xlu1 %610 }
 0x14a   :  { %v615_v43 = vsub.f32 %v605_v27, %v611_v52  ;;  %v616_v1 = vsub.f32 %v606_v28, %v611_v52 }
 0x14c   :  { %v619_v13 = vmul.f32 1.442695, %v615_v43  ;;  %v621_v41 = vmul.f32 1.442695, %v616_v1  ;;  %v201_v37 = vpop.permute.xlu0 %200 }
 0x14d   :  { %v209_v10 = vrot.slane %v201_v37, %v204_v32 }
 0x14e   :  { %747 = vpow2.f32 %v619_v13 }
 0x14f   :  { %749 = vpow2.f32 %v621_v41 }
 0x150   :  { %751 = vpow2.f32 %v623_v59 }
 0x151   :  { %753 = vpow2.f32 %v625_v14 }
 0x158   :  { %v748_v55 = vpop.eup %747 }
 0x159   :  { %v750_v0 = vpop.eup %749 }
 0x15a   :  { %v752_v5 = vpop.eup %751  ;;  %v627_v16 = vadd.f32 %v750_v0, %v748_v55 }
 0x15b   :  { %v754_v24 = vpop.eup %753 }
 0x15c   :  { %628 = vadd.xlane.f32.xlu1 %v627_v16  ;;  %v630_v63 = vadd.f32 %v754_v24, %v752_v5 }
 0x160   :  { %631 = vadd.xlane.f32.xlu1 %v630_v63 }
 0x171   :  { %197 = vperm.xlu1 %707, %v805_v8  }
 0x1e9   :  { %v629_v62 = vpop.xlane.xlu1 %628 }
 0x1ea   :  { %755 = vlog2.f32 %v629_v62 }
 0x1ed   :  { %v632_v36 = vpop.xlane.xlu1 %631 }
 0x1ee   :  { %757 = vlog2.f32 %v632_v36 }
 0x1f1   :  { %v198_v29 = vpop.permute.xlu1 %197 }
 0x1f2   :  { %v205_v35 = vrot.slane %v198_v29, %v204_v32 }
 0x1f4   :  { %v756_v9 = vpop.eup %755  ;;  %v211_v53 = vsel %vm210_vm3, %v209_v10, %v205_v35 }
 0x1f5   :  { %v634_v50 = vmul.f32 0.6931472, %v756_v9  ;;  %v214_v46 = vsel %vm213_vm4, %v211_v53, 0.0 }
 0x1f6   :  { %215 = vadd.xlane.f32.xlu0 %v214_v46 }
 0x1f7   :  { %v637_v11 = vadd.f32 %v634_v50, %v611_v52 }
 0x1f8   :  { %v758_v18 = vpop.eup %757 }
 0x1f9   :  { %v636_v48 = vmul.f32 0.6931472, %v758_v18  ;;  %v639_v7 = vmul.f32 %v637_v11, %v805_v8  ;;  %v185_v8 = vrot.slane %v171_v49, %v811_v12 }
 0x1fb   :  { %v638_v22 = vadd.f32 %v636_v48, %v614_v47  ;;  %644 = vperm.xlu1 %707, %v639_v7  }
 0x1fd   :  { %v640_v34 = vmul.f32 %v638_v22, %v787_v2  ;;  %v189_v2 = vsel %vm151_vm0, %v185_v8, 0.0 }
 0x1fe   :  { %v190_v23 = vadd.f32 %v189_v2, %v188_v20 }
 0x1ff   :  { %647 = vperm.xlu1 %707, %v640_v34  }
 0x223   :  { %191 = vadd.xlane.f32.xlu1 %v190_v23 }
 0x27a   :  { %v645_v42 = vpop.permute.xlu1 %644 }
 0x27b   :  { %v652_v21 = vrot.slane %v645_v42, %v204_v32 }
 0x27e   :  { %v648_v6 = vpop.permute.xlu1 %647 }
 0x27f   :  { %v656_v3 = vrot.slane %v648_v6, %v204_v32 }
 0x281   :  { %v657_v4 = vsel %vm210_vm3, %v656_v3, %v652_v21 }
 0x282   :  { %v659_v44 = vsel %vm213_vm4, %v657_v4, 0.0 }
 0x283   :  { %660 = vadd.xlane.f32.xlu1 %v659_v44  ;;  %v216_v54 = vpop.xlane.xlu0 %215 }
 0x284   :  { %v217_v25 = vsub.f32 %v216_v54, %v1010_v51 }
 0x286   :  { %v218_v28 = vmul.f32 %v217_v25, %v217_v25 }
 0x2b0   :  { %v192_v60 = vpop.xlane.xlu1 %191 }
 0x2b1   :  { %v193_v39 = vadd.f32 1e-09, %v192_v60 }
 0x2b3   :  { %v222_v38 = vmul.f32 6.2831855, %v193_v39  ;;  %v219_v12 = vmul.f32 2.0, %v193_v39 }
 0x2b5   :  { %759 = vlog2.f32 %v222_v38 }
 0x2b6   :  { %761 = vrcp.f32 %v219_v12 }
 0x2bf   :  { %v760_v19 = vpop.eup %759 }
 0x2c0   :  { %v224_v58 = vmul.f32 0.6931472, %v760_v19  ;;  %v762_v27 = vpop.eup %761 }
 0x2c1   :  { %v221_v40 = vmul.f32 %v762_v27, %v218_v28 }
 0x2c2   :  { %v225_v31 = vmul.f32 0.5, %v224_v58 }
 0x2c4   :  { %v226_v45 = vadd.f32 %v225_v31, %v221_v40 }
 0x310   :  { %v661_v47 = vpop.xlane.xlu1 %660 }
 0x311   :  { %v662_v33 = vsub.f32 0.0, %v661_v47 }
 0x313   :  { %v663_v52 = vadd.f32 %v662_v33, %v226_v45 }
 0x315   :  { %v665_v43 = vsel %vm664_vm5, %v663_v52, 0.0 }
 0x316   :  { %666 = vadd.xlane.f32.xlu1 %v665_v43 }
 0x3a3   :  { %v667_v1 = vpop.xlane.xlu1 %666 }
 0x3a4   :  { %v668_v59 = vrot.slane %v667_v1, 4 }
 0x3a6   :  { %v669_v13 = vadd.f32 %v668_v59, %v667_v1 }
 0x3a8   :  { %v670_v41 = vrot.slane %v669_v13, 2 }
 0x3aa   :  { %v671_v14 = vadd.f32 %v670_v41, %v669_v13 }
 0x3ac   :  { %v672_v55 = vrot.slane %v671_v14, 1 }
 0x3ae   :  { %v673_v0 = vadd.f32 %v672_v55, %v671_v14 }
 0x3b0   :  { %694 = vpush %v673_v0 }
 0x3e1   :  { %s695_s0 = spop %694 }
 0x3e2   :  { %v675_v51 = vstv %s695_s0 }
 0x3e3   :  { %676 = vst [vmem:[%s1082_s2] sm:$0x1] %v675_v51 }

</bundles_post_ra>
